<compile_context>
chip_gen: v6e
topology: v6e:2x2x1
jax: 0.10.0
libtpu: 0.0.40
codegen_flags: <defaults>
</compile_context>

<pallas_src>
import functools

import jax
import jax.numpy as jnp
from jax import lax
from jax.experimental import pallas as pl
from jax.experimental.pallas import tpu as pltpu

KERNEL_SIZES = (40, 20, 10)
NUM_FILTERS = 32
BN_EPS = 1e-5
K_MAX = max(KERNEL_SIZES)


@functools.lru_cache(maxsize=None)
def _roll_matches_numpy():
    """True iff pltpu.roll follows np.roll's shift direction on this backend.

    The im2col assembly needs `rolled[:, j] == x[:, j + k]`; probing the
    direction once with a trivial kernel makes the static shift sign robust.
    """
    def probe(x_ref, o_ref):
        o_ref[...] = pltpu.roll(x_ref[...], 1, axis=1)

    vmem = pl.BlockSpec(memory_space=pltpu.MemorySpace.VMEM)
    x = jnp.tile(jnp.arange(128, dtype=jnp.float32)[None, :], (8, 1))
    out = pl.pallas_call(
        probe,
        out_shape=jax.ShapeDtypeStruct((8, 128), jnp.float32),
        in_specs=[vmem],
        out_specs=vmem,
    )(x)
    return bool(out[0, 0] == 127.0)  # np.roll: last element moves to the front


def _inception_kernel(x_ref, mp_ref, wt_ref, gamma_ref, beta_ref, out_ref,
                      rhs_ref, *, n, c, l, l_slab, roll_np):
    """Fused in-VMEM im2col -> conv matmul -> BatchNorm(train) -> ReLU.

    x_ref     : (n, c, l_slab) f32  zero-padded ("same" conv) input rows
    mp_ref    : (n, c, l_slab) f32  MaxPool1d(3,1,1) rows (first l cols valid)
    wt_ref    : (4F, R) bf16        packed conv weights (R = contraction dim)
    gamma_ref : (4F, 1) f32
    beta_ref  : (4F, 1) f32
    out_ref   : (4F, n*l) f32       ReLU(BN(conv)), channel-major, lane-dense
    rhs_ref   : (R, n*l) f32 VMEM   scratch im2col matrix
    """
    cols = n * l
    r0 = c * K_MAX  # first row of the maxpool/1x1 branch

    # ---- Build the im2col RHS in VMEM scratch (f32; cast to bf16 at the dot).
    # Row c*k + cc holds x[nn, cc, t + k - K_MAX//2] at column nn*l + t.
    rhs_ref[...] = jnp.zeros_like(rhs_ref)
    for nn in range(n):
        sig = x_ref[nn]                               # (c, l_slab)
        for k in range(K_MAX):                        # static unroll: 40 taps
            if k == 0:
                win = sig[:, 0:l]
            else:
                amt = (l_slab - k) % l_slab if roll_np else k
                # win[:, j] = sig[:, j + k]; j + k <= l + K_MAX - 2 < l_slab,
                # so the circular wraparound region is never read.
                win = pltpu.roll(sig, amt, axis=1)[:, 0:l]
            rhs_ref[c * k:c * (k + 1), nn * l:(nn + 1) * l] = win
        rhs_ref[r0:r0 + c, nn * l:(nn + 1) * l] = mp_ref[nn][:, 0:l]

    # ---- One bf16 MXU pass: (4F, R) @ (R, N*L) with f32 accumulation.
    pre = jnp.dot(wt_ref[...], rhs_ref[...].astype(jnp.bfloat16),
                  preferred_element_type=jnp.float32)          # (4F, cols)

    # ---- BatchNorm1d training-mode statistics (biased var), single pass:
    # fold the aligned 128-lane column blocks (VALU), then lane-reduce (XLU).
    if cols == 2 * l:
        a_half = pre[:, 0:l]
        b_half = pre[:, l:cols]
        s1 = jnp.sum(a_half + b_half, axis=1, keepdims=True)            # (4F,1)
        s2 = jnp.sum(a_half * a_half + b_half * b_half, axis=1, keepdims=True)
    else:
        s1 = jnp.sum(pre, axis=1, keepdims=True)
        s2 = jnp.sum(pre * pre, axis=1, keepdims=True)
    inv_cnt = jnp.float32(1.0 / cols)
    mean = s1 * inv_cnt
    var = jnp.maximum(s2 * inv_cnt - mean * mean, 0.0)
    inv_std = lax.rsqrt(var + BN_EPS)

    scale = gamma_ref[...] * inv_std                                    # (4F,1)
    bias = beta_ref[...] - mean * scale
    out_ref[...] = jnp.maximum(pre * scale + bias, 0.0)   # ReLU, lane-dense


def _pack_weights(w1, w2, w3, w4, c, r_dim):
    """Pack all four conv kernels into one (4F, r_dim) channel-major matrix.

    Column c*k + cc = tap k (in the K_MAX frame) of input channel cc; the
    smaller kernels are shifted into the K_MAX tap frame; the maxpool 1x1
    branch occupies columns [c*K_MAX, c*K_MAX + c).  Cast to bf16 for the MXU.
    """
    f = w1.shape[0]
    wt = jnp.zeros((4 * f, r_dim), jnp.float32)

    def place(wt, w, k_size, row0):
        col0 = (K_MAX // 2 - k_size // 2) * c
        blk = jnp.transpose(w, (0, 2, 1)).reshape(f, k_size * c)  # col = k*c + cc
        return wt.at[row0:row0 + f, col0:col0 + k_size * c].set(blk)

    wt = place(wt, w1, KERNEL_SIZES[0], 0 * f)
    wt = place(wt, w2, KERNEL_SIZES[1], 1 * f)
    wt = place(wt, w3, KERNEL_SIZES[2], 2 * f)
    wt = wt.at[3 * f:4 * f, c * K_MAX:c * K_MAX + c].set(w4[:, :, 0])
    return wt.astype(jnp.bfloat16)


@functools.partial(jax.jit, static_argnums=(7,))
def _inception_block_impl(x_ncl, w1, w2, w3, w4, gamma, beta, roll_np):
    n, c, l = x_ncl.shape
    f = w1.shape[0]
    pad_l = K_MAX // 2
    l_slab = pl.cdiv(l + K_MAX - 1, 128) * 128       # padded signal row width
    r_dim = pl.cdiv(c * K_MAX + c, 128) * 128        # matmul contraction dim
    cols = n * l

    x = x_ncl.astype(jnp.float32)
    # Zero-padded "same" conv rows: [0]*pad_l ++ x ++ zeros (covers pad_r).
    x_rows = jnp.pad(x, ((0, 0), (0, 0), (pad_l, l_slab - l - pad_l)))
    # MaxPool1d(kernel=3, stride=1, padding=1); PyTorch pads with -inf.
    xm = jnp.pad(x, ((0, 0), (0, 0), (1, 1)), constant_values=-jnp.inf)
    mp = jnp.maximum(jnp.maximum(xm[:, :, 0:l], xm[:, :, 1:l + 1]),
                     xm[:, :, 2:l + 2])
    mp_rows = jnp.pad(mp, ((0, 0), (0, 0), (0, l_slab - l)))

    wt = _pack_weights(w1, w2, w3, w4, c, r_dim)                 # (4F, R) bf16
    gamma_col = gamma.reshape(4 * f, 1).astype(jnp.float32)
    beta_col = beta.reshape(4 * f, 1).astype(jnp.float32)

    vmem = pl.BlockSpec(memory_space=pltpu.MemorySpace.VMEM)
    out = pl.pallas_call(
        functools.partial(_inception_kernel, n=n, c=c, l=l, l_slab=l_slab,
                          roll_np=roll_np),
        out_shape=jax.ShapeDtypeStruct((4 * f, cols), jnp.float32),
        in_specs=[vmem] * 5,
        out_specs=vmem,
        scratch_shapes=[pltpu.VMEM((r_dim, cols), jnp.float32)],
    )(x_rows, mp_rows, wt, gamma_col, beta_col)

    # (4F, N*L) -> (N, 4F, L): major-axis permute only (last dim untouched),
    # much cheaper than a lane<->sublane transpose of the output slab.
    return jnp.transpose(out.reshape(4 * f, n, l), (1, 0, 2))


def inception_block(x_ncl, w1, w2, w3, w4, gamma, beta):
    """x_ncl: (N, C_in, L) float32 (PyTorch NCL). w_i: (F, C_in, K_i).

    Returns (N, 4*F, L) float32, matching the PyTorch module output layout.
    """
    return _inception_block_impl(x_ncl, w1, w2, w3, w4, gamma, beta,
                                 _roll_matches_numpy())


def _reference(x_ncl, w1, w2, w3, w4, gamma, beta):
    """Pure-JAX reference of the PyTorch InceptionBlock forward (train mode)."""
    N, C, L = x_ncl.shape

    def conv_same(x, w, K):
        return lax.conv_general_dilated(
            x, w, window_strides=(1,), padding=[(K // 2, (K - 1) // 2)],
            dimension_numbers=("NCH", "OIH", "NCH"),
            precision=lax.Precision.HIGHEST)

    o1 = conv_same(x_ncl, w1, KERNEL_SIZES[0])
    o2 = conv_same(x_ncl, w2, KERNEL_SIZES[1])
    o3 = conv_same(x_ncl, w3, KERNEL_SIZES[2])
    xp = jnp.pad(x_ncl, ((0, 0), (0, 0), (1, 1)), constant_values=-jnp.inf)
    mp = jnp.maximum(jnp.maximum(xp[:, :, 0:L], xp[:, :, 1:L + 1]),
                     xp[:, :, 2:L + 2])
    o4 = conv_same(mp, w4, 1)
    y = jnp.concatenate([o1, o2, o3, o4], axis=1)                  # (N, 4F, L)
    mean = jnp.mean(y, axis=(0, 2), keepdims=True)
    var = jnp.mean((y - mean) ** 2, axis=(0, 2), keepdims=True)    # biased
    yn = (y - mean) * lax.rsqrt(var + BN_EPS)
    yn = yn * gamma[None, :, None] + beta[None, :, None]
    return jnp.maximum(yn, 0.0)


if __name__ == "__main__":
    # Module defaults: input_size=2, kernel_sizes=(40, 20, 10), num_filters=32.
    N, C_IN, L = 2, 2, 128
    F = NUM_FILTERS

    key = jax.random.PRNGKey(0)
    kx, k1, k2, k3, k4, kg, kb = jax.random.split(key, 7)

    x = jax.random.normal(kx, (N, C_IN, L), dtype=jnp.float32)

    def conv_init(k, shape):
        fan_in = shape[1] * shape[2]
        return jax.random.normal(k, shape, dtype=jnp.float32) / jnp.sqrt(fan_in)

    w1 = conv_init(k1, (F, C_IN, KERNEL_SIZES[0]))
    w2 = conv_init(k2, (F, C_IN, KERNEL_SIZES[1]))
    w3 = conv_init(k3, (F, C_IN, KERNEL_SIZES[2]))
    w4 = conv_init(k4, (F, C_IN, 1))
    gamma = 1.0 + 0.1 * jax.random.normal(kg, (4 * F,), dtype=jnp.float32)
    beta = 0.1 * jax.random.normal(kb, (4 * F,), dtype=jnp.float32)

    out = inception_block(x, w1, w2, w3, w4, gamma, beta)
    jax.block_until_ready(out)
    assert out.shape == (N, 4 * F, L) and out.dtype == jnp.float32

    ref = _reference(x, w1, w2, w3, w4, gamma, beta)
    max_err = float(jnp.max(jnp.abs(out - ref)))
    # bf16 MXU operands (f32 accumulation) vs. an f32 HIGHEST-precision
    # reference -> agreement at the ~1e-2 level; tolerance set accordingly.
    assert jnp.allclose(out, ref, rtol=5e-2, atol=5e-2), max_err
    print("KERNEL_OK")
</pallas_src>

<mosaic_0001>
module attributes {stable_mosaic.version = 11 : i64} {
  func.func @probe(%arg0: memref<8x128xf32, #tpu.memory_space<vmem>>, %arg1: memref<8x128xf32, #tpu.memory_space<vmem>>) attributes {dimension_semantics = [], scalar_prefetch = 0 : i64, scratch_operands = 0 : i64, tpu.core_type = #tpu.core_type<tc>} {
    %c0 = arith.constant 0 : index
    %c0_0 = arith.constant 0 : index
    %0 = vector.load %arg0[%c0, %c0_0] : memref<8x128xf32, #tpu.memory_space<vmem>>, vector<8x128xf32>
    %c1_i32 = arith.constant 1 : i32
    %1 = tpu.dynamic_rotate %0 by %c1_i32 dim 1 : vector<8x128xf32>, i32 -> vector<8x128xf32>
    %c0_1 = arith.constant 0 : index
    %c0_2 = arith.constant 0 : index
    %2 = vector.load %arg1[%c0_1, %c0_2] : memref<8x128xf32, #tpu.memory_space<vmem>>, vector<8x128xf32>
    tpu.vector_store %arg1[%c0_1, %c0_2], %1 {strides = array<i32>} : memref<8x128xf32, #tpu.memory_space<vmem>>, vector<8x128xf32>,
    return
  }
}

</mosaic_0001>

<bundles_post_ra>
// kernel: tpu_custom_call.1
= control target key start
LH: loop header
LB: loop body
LE: loop exit
PB: predicated region body
PF: predicated region fallthrough
CT: control target
= control target key end

     0   :  { %6 = vsyncpa [#allocation3], 0  ;;  %s106_s0 = inlined_call_operand.hbm [shape: f32[8,128], index: 0, kind: input, shape index: {}]   ;;  %s107_s1 = inlined_call_operand.hbm [shape: f32[8,128], index: 1, kind: output, shape index: {}]  }
   0x1   :  { %7 = vsyncpa [#allocation4], 0  ;;  %s87_s6 = smov [#allocation2]  }
   0x2   :  { %s14_s7 = sshll.u32 %s87_s6, 4  ;;  %s15_s7 = int_to_ptr.vmem [resolvable:$true] %s14_s7 }
   0x3   :  { %s51_s8 = scalar_lea.vmem %s15_s7, 128  ;;  %p56_p1 = scmp.lt.s32.totalorder %s15_s7, %s15_s7 }
   0x4   :  { %p52_p0 = scmp.ne.s32.totalorder %s15_s7, %s51_s8  ;;  %p57_p2 = scmp.lt.s32.totalorder %s51_s8, %s51_s8 }
   0x6   :  { %p58_p3 = por %p57_p2, %p56_p1 }
   0x8   :  { %p59_p4 = pnand %p58_p3, %p52_p0 }
   0xa   :  { %62 = shalt.err (!%p59_p4)
}
   0xb   :  { %17 = dma.hbm_to_vmem [thread:$0]  %s106_s0, 128, %s15_s7, [#allocation3]  }
   0xc   :  { %83 = dma.done.wait [#allocation3], 128  }
   0xd   :  { %84 = vsyncadd [#allocation3], 4294967168  ;;  %v21_v0 = vld [vmem:[#allocation2] sm:$0xff]  ;;  %s88_s11 = smov 1   ;;  %s89_s12 = smov [#allocation5]  }
   0xe   :  { %22 = vrot.lane.b32.xlu0 %v21_v0, %s88_s11  ;;  %s31_s13 = sshll.u32 %s89_s12, 4  ;;  %s32_s13 = int_to_ptr.vmem [resolvable:$true] %s31_s13 }
   0xf   :  { %s63_s14 = scalar_lea.vmem %s32_s13, 128  ;;  %p68_p6 = scmp.lt.s32.totalorder %s32_s13, %s32_s13 }
  0x10   :  { %p64_p5 = scmp.ne.s32.totalorder %s32_s13, %s63_s14  ;;  %p69_p7 = scmp.lt.s32.totalorder %s63_s14, %s63_s14 }
  0x12   :  { %p70_p8 = por %p69_p7, %p68_p6 }
  0x14   :  { %p71_p9 = pnand %p70_p8, %p64_p5 }
  0x80   :  { %v23_v1 = vpop.permute.xlu0 %22 }
  0x81   :  { %24 = vst [vmem:[#allocation5] sm:$0xff] %v23_v1 }
  0x82   :  { %74 = shalt.err (!%p71_p9)
}
  0x83   :  { %34 = dma.vmem_to_hbm [thread:$0]  %s32_s13, 128, %s107_s1, [#allocation4]  }
  0x84   :  { %85 = dma.done.wait [#allocation4], 128  }
  0x85   :  { %86 = vsyncadd [#allocation4], 4294967168 }
  0x86   :  { %38 = vsyncpa [#allocation3], 1 }
  0x87   :  { %39 = vsyncpa [#allocation4], 1 }

</bundles_post_ra>
